<compile_context>
chip_gen: v7x
topology: tpu7x:2x2x1
jax: 0.10.0
libtpu: 0.0.40
codegen_flags: <defaults>
</compile_context>

<pallas_src>
import functools

import jax
import jax.numpy as jnp
from jax import lax
from jax.experimental import pallas as pl
from jax.experimental.pallas import tpu as pltpu

EPS = 1e-5
NEG_SLOPE = 0.2


def _conv3x3_instnorm(pad_ref, col_ref, w_ref, b_ref, lmask, rmask, H, W, C):
    """3x3 'same' conv (+bias) followed by InstanceNorm2d(affine=False).

    pad_ref: (C, (W+1) + H*W + (W+1)) bf16 flat buffer; zero halo, interior = image.
    col_ref: (9*C, H*W) bf16 im2col scratch.
    w_ref:   (C_out, 9*C_in) bf16; columns ordered (kh, kw, c_in).
    b_ref:   (C, 1) f32 bias.
    lmask/rmask: (1, H*W) bf16 {0,1} masks killing horizontal wrap-around columns.
    Returns (C, H*W) f32 normalized activations (as a value).
    """
    HW = H * W
    LPAD = W + 1

    # Build im2col: tap (dh, dw) is the image shifted by dh rows / dw cols, which
    # in the flat layout is a static lane-offset slice of the padded buffer.
    k = 0
    for dh in (-1, 0, 1):
        for dw in (-1, 0, 1):
            s = pad_ref[:, pl.ds(LPAD + dh * W + dw, HW)]      # (C, HW) bf16
            if dw == -1:
                s = s * lmask                                  # kill w==0 columns
            elif dw == 1:
                s = s * rmask                                  # kill w==W-1 columns
            col_ref[pl.ds(k * C, C), :] = s
            k += 1

    # Single MXU matmul, f32 accumulation: (C, 9C) x (9C, HW) -> (C, HW).
    y = jnp.dot(w_ref[...], col_ref[...], preferred_element_type=jnp.float32)
    y = y + b_ref[...]                                         # bias, broadcast over lanes

    # InstanceNorm statistics (biased variance), two-pass in f32.
    inv_n = 1.0 / float(HW)
    mean = jnp.sum(y, axis=-1, keepdims=True) * inv_n          # (C, 1)
    d = y - mean
    var = jnp.sum(d * d, axis=-1, keepdims=True) * inv_n       # (C, 1)
    return d * lax.rsqrt(var + EPS)


def _residual_block_kernel(x_ref, w1_ref, b1_ref, w2_ref, b2_ref, out_ref,
                           pad_ref, col_ref, *, H, W):
    C = x_ref.shape[1]
    HW = H * W
    LPAD = W + 1

    # Zero ONLY the halo columns (interior is fully overwritten below).  Done
    # every step so it stays correct if the batch axis is split across
    # TensorCores; it is only 2*(W+1)*C bf16 elements.
    halo = jnp.zeros((C, LPAD), jnp.bfloat16)
    pad_ref[:, pl.ds(0, LPAD)] = halo
    pad_ref[:, pl.ds(LPAD + HW, LPAD)] = halo

    # Masks for the destination columns that would wrap across image rows when
    # the 3x3 window is shifted horizontally in the flat (C, H*W) layout.
    col_idx = lax.broadcasted_iota(jnp.int32, (1, HW), 1) % W
    lmask = (col_idx != 0).astype(jnp.bfloat16)
    rmask = (col_idx != (W - 1)).astype(jnp.bfloat16)

    # Stage 1: conv1 -> InstanceNorm -> LeakyReLU(0.2).
    pad_ref[:, pl.ds(LPAD, HW)] = x_ref[0].astype(jnp.bfloat16)
    h = _conv3x3_instnorm(pad_ref, col_ref, w1_ref, b1_ref, lmask, rmask, H, W, C)
    h = jnp.where(h > 0, h, NEG_SLOPE * h)

    # Stage 2: conv2 -> InstanceNorm.  The intermediate never leaves VMEM; the
    # same padded buffer is reused (its interior is overwritten with h).
    pad_ref[:, pl.ds(LPAD, HW)] = h.astype(jnp.bfloat16)
    r = _conv3x3_instnorm(pad_ref, col_ref, w2_ref, b2_ref, lmask, rmask, H, W, C)

    # Residual add: re-read x from its resident VMEM input block.
    out_ref[0] = (x_ref[0].astype(jnp.float32) + r).astype(out_ref.dtype)


def _vmem_limit_bytes():
    # Leave headroom for the compiler's double buffers / internal scratch; do
    # not pin to the full physical VMEM (64 MiB on v7x).
    try:
        cap = int(pltpu.get_tpu_info().vmem_capacity_bytes)
        return min(cap * 3 // 4, 100 * 1024 * 1024)
    except Exception:
        return 48 * 1024 * 1024  # safe on every generation


@jax.jit
def residual_block(x_nchw, w1, b1, w2, b2):
    """x_nchw: (B, C, H, W); w*: (C, C, 3, 3) [PyTorch OIHW]; b*: (C,)."""
    B, C, H, W = x_nchw.shape
    HW = H * W
    x = x_nchw.reshape(B, C, HW)                      # lane-dense (C, H*W) blocks

    # OIHW -> (C_out, 9*C_in) with columns ordered (kh, kw, c_in) to match the
    # im2col row order; bf16 into the MXU, f32 accumulation.
    w1m = jnp.transpose(w1, (0, 2, 3, 1)).reshape(C, 9 * C).astype(jnp.bfloat16)
    w2m = jnp.transpose(w2, (0, 2, 3, 1)).reshape(C, 9 * C).astype(jnp.bfloat16)
    b1m = b1.reshape(C, 1).astype(jnp.float32)
    b2m = b2.reshape(C, 1).astype(jnp.float32)

    kernel = functools.partial(_residual_block_kernel, H=H, W=W)
    y = pl.pallas_call(
        kernel,
        out_shape=jax.ShapeDtypeStruct((B, C, HW), x_nchw.dtype),
        grid_spec=pltpu.PrefetchScalarGridSpec(
            num_scalar_prefetch=0,
            grid=(B,),
            in_specs=[
                pl.BlockSpec((1, C, HW), lambda i: (i, 0, 0)),
                pl.BlockSpec((C, 9 * C), lambda i: (0, 0)),
                pl.BlockSpec((C, 1), lambda i: (0, 0)),
                pl.BlockSpec((C, 9 * C), lambda i: (0, 0)),
                pl.BlockSpec((C, 1), lambda i: (0, 0)),
            ],
            out_specs=pl.BlockSpec((1, C, HW), lambda i: (i, 0, 0)),
            scratch_shapes=[
                pltpu.VMEM((C, HW + 2 * (W + 1)), jnp.bfloat16),  # shared flat padded buf
                pltpu.VMEM((9 * C, HW), jnp.bfloat16),            # im2col
            ],
        ),
        compiler_params=pltpu.CompilerParams(
            dimension_semantics=("parallel",),
            vmem_limit_bytes=_vmem_limit_bytes(),
        ),
    )(x, w1m, b1m, w2m, b2m)
    return y.reshape(B, C, H, W)


# ---------------- pure-JAX reference (for correctness check) ----------------
def _ref_conv(x_nhwc, w_hwio, b):
    y = lax.conv_general_dilated(
        x_nhwc.astype(jnp.float32), w_hwio.astype(jnp.float32),
        window_strides=(1, 1), padding="SAME",
        dimension_numbers=("NHWC", "HWIO", "NHWC"),
        precision=lax.Precision.HIGHEST)
    return y + b.reshape(1, 1, 1, -1)


def _ref_instnorm(y):
    m = jnp.mean(y, axis=(1, 2), keepdims=True)
    v = jnp.mean((y - m) ** 2, axis=(1, 2), keepdims=True)
    return (y - m) * lax.rsqrt(v + EPS)


def residual_block_ref(x_nchw, w1, b1, w2, b2):
    x = jnp.transpose(x_nchw, (0, 2, 3, 1)).astype(jnp.float32)
    w1_hwio = jnp.transpose(w1, (2, 3, 1, 0))
    w2_hwio = jnp.transpose(w2, (2, 3, 1, 0))
    h = _ref_instnorm(_ref_conv(x, w1_hwio, b1))
    h = jnp.where(h > 0, h, NEG_SLOPE * h)
    h = _ref_instnorm(_ref_conv(h, w2_hwio, b2))
    y = x + h
    return jnp.transpose(y, (0, 3, 1, 2))


if __name__ == "__main__":
    B, C, H, W = 2, 4, 16, 16
    key = jax.random.PRNGKey(0)
    kx, k1, kb1, k2, kb2 = jax.random.split(key, 5)

    x = jax.random.normal(kx, (B, C, H, W), jnp.float32)
    # deterministic synthetic params (shapes match nn.Conv2d(C, C, 3, padding=1))
    fan_in = C * 3 * 3
    bound = 1.0 / (fan_in ** 0.5)
    w1 = jax.random.uniform(k1, (C, C, 3, 3), jnp.float32, -bound, bound)
    b1 = jax.random.uniform(kb1, (C,), jnp.float32, -bound, bound)
    w2 = jax.random.uniform(k2, (C, C, 3, 3), jnp.float32, -bound, bound)
    b2 = jax.random.uniform(kb2, (C,), jnp.float32, -bound, bound)

    out = jax.block_until_ready(residual_block(x, w1, b1, w2, b2))
    ref = jax.block_until_ready(residual_block_ref(x, w1, b1, w2, b2))

    assert out.shape == (B, C, H, W)
    # bf16 MXU inputs (default precision) vs f32 HIGHEST reference -> slightly
    # looser tolerance than a pure-f32 comparison.
    err = float(jnp.max(jnp.abs(out - ref)))
    assert jnp.allclose(out, ref, atol=2e-2, rtol=2e-2), err

    print("KERNEL_OK")
</pallas_src>

<mosaic_0001>
module attributes {stable_mosaic.version = 11 : i64} {
  func.func @_residual_block_kernel(%arg0: i32, %arg1: memref<1x4x256xf32, #tpu.memory_space<vmem>>, %arg2: memref<4x36xbf16, #tpu.memory_space<vmem>>, %arg3: memref<4x1xf32, #tpu.memory_space<vmem>>, %arg4: memref<4x36xbf16, #tpu.memory_space<vmem>>, %arg5: memref<4x1xf32, #tpu.memory_space<vmem>>, %arg6: memref<1x4x256xf32, #tpu.memory_space<vmem>>, %arg7: memref<4x290xbf16, #tpu.memory_space<vmem>>, %arg8: memref<36x256xbf16, #tpu.memory_space<vmem>>) attributes {dimension_semantics = [#tpu.dimension_semantics<parallel>], iteration_bounds = array<i64: 2>, scalar_prefetch = 0 : i64, scratch_operands = 2 : i64, tpu.core_type = #tpu.core_type<tc>, window_params = [{transform_indices = @transform_0, window_bounds = array<i64: 1, 4, 256>}, {pipeline_mode = #tpu.pipeline_mode<synchronous>, transform_indices = @transform_1, window_bounds = array<i64: 4, 36>}, {pipeline_mode = #tpu.pipeline_mode<synchronous>, transform_indices = @transform_2, window_bounds = array<i64: 4, 1>}, {pipeline_mode = #tpu.pipeline_mode<synchronous>, transform_indices = @transform_3, window_bounds = array<i64: 4, 36>}, {pipeline_mode = #tpu.pipeline_mode<synchronous>, transform_indices = @transform_4, window_bounds = array<i64: 4, 1>}, {transform_indices = @transform_5, window_bounds = array<i64: 1, 4, 256>}]} {
    %cst = arith.constant 0.000000e+00 : bf16
    %0 = vector.broadcast %cst : bf16 to vector<4x17xbf16>
    %c0 = arith.constant 0 : index
    %c0_0 = arith.constant 0 : index
    %1 = vector.load %arg7[%c0, %c0_0] : memref<4x290xbf16, #tpu.memory_space<vmem>>, vector<4x17xbf16>
    tpu.vector_store %arg7[%c0, %c0_0], %0 {strides = array<i32>} : memref<4x290xbf16, #tpu.memory_space<vmem>>, vector<4x17xbf16>,
    %c0_1 = arith.constant 0 : index
    %c273 = arith.constant 273 : index
    %2 = vector.load %arg7[%c0_1, %c273] : memref<4x290xbf16, #tpu.memory_space<vmem>>, vector<4x17xbf16>
    tpu.vector_store %arg7[%c0_1, %c273], %0 {strides = array<i32>} : memref<4x290xbf16, #tpu.memory_space<vmem>>, vector<4x17xbf16>,
    %3 = tpu.iota {dimensions = array<i32: 1>} : vector<1x256xi32>
    %c16_i32 = arith.constant 16 : i32
    %c0_i32 = arith.constant 0 : i32
    %4 = arith.cmpi eq, %c16_i32, %c0_i32 : i32
    %c1_i32 = arith.constant 1 : i32
    %5 = arith.select %4, %c1_i32, %c16_i32 : i32
    %6 = vector.broadcast %5 : i32 to vector<1x256xi32>
    %7 = arith.remsi %3, %6 : vector<1x256xi32>
    %c0_i32_2 = arith.constant 0 : i32
    %8 = vector.broadcast %c0_i32_2 : i32 to vector<1x256xi32>
    %9 = arith.cmpi ne, %7, %8 : vector<1x256xi32>
    %c0_i32_3 = arith.constant 0 : i32
    %10 = vector.broadcast %c0_i32_3 : i32 to vector<1x256xi32>
    %11 = arith.cmpi slt, %7, %10 : vector<1x256xi32>
    %c0_i32_4 = arith.constant 0 : i32
    %12 = arith.cmpi slt, %5, %c0_i32_4 : i32
    %13 = vector.broadcast %12 : i1 to vector<1x256xi1>
    %14 = vector.broadcast %13 : vector<1x256xi1> to vector<1x256xi1>
    %15 = arith.xori %11, %14 : vector<1x256xi1>
    %16 = arith.andi %15, %9 : vector<1x256xi1>
    %17 = vector.broadcast %5 : i32 to vector<1x256xi32>
    %18 = arith.addi %7, %17 : vector<1x256xi32>
    %19 = arith.select %16, %18, %7 : vector<1x256xi1>, vector<1x256xi32>
    %c0_i32_5 = arith.constant 0 : i32
    %20 = vector.broadcast %c0_i32_5 : i32 to vector<1x256xi32>
    %21 = arith.cmpi ne, %19, %20 : vector<1x256xi32>
    %22 = arith.extui %21 : vector<1x256xi1> to vector<1x256xi32>
    %23 = arith.sitofp %22 : vector<1x256xi32> to vector<1x256xf32>
    %24 = arith.truncf %23 : vector<1x256xf32> to vector<1x256xbf16>
    %c15_i32 = arith.constant 15 : i32
    %25 = vector.broadcast %c15_i32 : i32 to vector<1x256xi32>
    %26 = arith.cmpi ne, %19, %25 : vector<1x256xi32>
    %27 = arith.extui %26 : vector<1x256xi1> to vector<1x256xi32>
    %28 = arith.sitofp %27 : vector<1x256xi32> to vector<1x256xf32>
    %29 = arith.truncf %28 : vector<1x256xf32> to vector<1x256xbf16>
    %c0_6 = arith.constant 0 : index
    %c0_7 = arith.constant 0 : index
    %c0_8 = arith.constant 0 : index
    %30 = vector.load %arg1[%c0_6, %c0_7, %c0_8] : memref<1x4x256xf32, #tpu.memory_space<vmem>>, vector<1x4x256xf32>
    %31 = vector.shape_cast %30 : vector<1x4x256xf32> to vector<4x256xf32>
    %32 = arith.truncf %31 : vector<4x256xf32> to vector<4x256xbf16>
    %c0_9 = arith.constant 0 : index
    %c17 = arith.constant 17 : index
    %33 = vector.load %arg7[%c0_9, %c17] : memref<4x290xbf16, #tpu.memory_space<vmem>>, vector<4x256xbf16>
    tpu.vector_store %arg7[%c0_9, %c17], %32 {strides = array<i32>} : memref<4x290xbf16, #tpu.memory_space<vmem>>, vector<4x256xbf16>,
    %c0_10 = arith.constant 0 : index
    %c0_11 = arith.constant 0 : index
    %34 = vector.load %arg7[%c0_10, %c0_11] : memref<4x290xbf16, #tpu.memory_space<vmem>>, vector<4x256xbf16>
    %35 = vector.broadcast %24 : vector<1x256xbf16> to vector<4x256xbf16>
    %36 = arith.mulf %34, %35 : vector<4x256xbf16>
    %c0_12 = arith.constant 0 : index
    %c0_13 = arith.constant 0 : index
    %37 = vector.load %arg8[%c0_12, %c0_13] : memref<36x256xbf16, #tpu.memory_space<vmem>>, vector<4x256xbf16>
    tpu.vector_store %arg8[%c0_12, %c0_13], %36 {strides = array<i32>} : memref<36x256xbf16, #tpu.memory_space<vmem>>, vector<4x256xbf16>,
    %c0_14 = arith.constant 0 : index
    %c1 = arith.constant 1 : index
    %38 = vector.load %arg7[%c0_14, %c1] : memref<4x290xbf16, #tpu.memory_space<vmem>>, vector<4x256xbf16>
    %c4 = arith.constant 4 : index
    %c0_15 = arith.constant 0 : index
    %39 = vector.load %arg8[%c4, %c0_15] : memref<36x256xbf16, #tpu.memory_space<vmem>>, vector<4x256xbf16>
    tpu.vector_store %arg8[%c4, %c0_15], %38 {strides = array<i32>} : memref<36x256xbf16, #tpu.memory_space<vmem>>, vector<4x256xbf16>,
    %c0_16 = arith.constant 0 : index
    %c2 = arith.constant 2 : index
    %40 = vector.load %arg7[%c0_16, %c2] : memref<4x290xbf16, #tpu.memory_space<vmem>>, vector<4x256xbf16>
    %41 = vector.broadcast %29 : vector<1x256xbf16> to vector<4x256xbf16>
    %42 = arith.mulf %40, %41 : vector<4x256xbf16>
    %c8 = arith.constant 8 : index
    %c0_17 = arith.constant 0 : index
    %43 = vector.load %arg8[%c8, %c0_17] : memref<36x256xbf16, #tpu.memory_space<vmem>>, vector<4x256xbf16>
    tpu.vector_store %arg8[%c8, %c0_17], %42 {strides = array<i32>} : memref<36x256xbf16, #tpu.memory_space<vmem>>, vector<4x256xbf16>,
    %c0_18 = arith.constant 0 : index
    %c16 = arith.constant 16 : index
    %44 = vector.load %arg7[%c0_18, %c16] : memref<4x290xbf16, #tpu.memory_space<vmem>>, vector<4x256xbf16>
    %45 = vector.broadcast %24 : vector<1x256xbf16> to vector<4x256xbf16>
    %46 = arith.mulf %44, %45 : vector<4x256xbf16>
    %c12 = arith.constant 12 : index
    %c0_19 = arith.constant 0 : index
    %47 = vector.load %arg8[%c12, %c0_19] : memref<36x256xbf16, #tpu.memory_space<vmem>>, vector<4x256xbf16>
    tpu.vector_store %arg8[%c12, %c0_19], %46 {strides = array<i32>} : memref<36x256xbf16, #tpu.memory_space<vmem>>, vector<4x256xbf16>,
    %c0_20 = arith.constant 0 : index
    %c17_21 = arith.constant 17 : index
    %48 = vector.load %arg7[%c0_20, %c17_21] : memref<4x290xbf16, #tpu.memory_space<vmem>>, vector<4x256xbf16>
    %c16_22 = arith.constant 16 : index
    %c0_23 = arith.constant 0 : index
    %49 = vector.load %arg8[%c16_22, %c0_23] : memref<36x256xbf16, #tpu.memory_space<vmem>>, vector<4x256xbf16>
    tpu.vector_store %arg8[%c16_22, %c0_23], %48 {strides = array<i32>} : memref<36x256xbf16, #tpu.memory_space<vmem>>, vector<4x256xbf16>,
    %c0_24 = arith.constant 0 : index
    %c18 = arith.constant 18 : index
    %50 = vector.load %arg7[%c0_24, %c18] : memref<4x290xbf16, #tpu.memory_space<vmem>>, vector<4x256xbf16>
    %51 = vector.broadcast %29 : vector<1x256xbf16> to vector<4x256xbf16>
    %52 = arith.mulf %50, %51 : vector<4x256xbf16>
    %c20 = arith.constant 20 : index
    %c0_25 = arith.constant 0 : index
    %53 = vector.load %arg8[%c20, %c0_25] : memref<36x256xbf16, #tpu.memory_space<vmem>>, vector<4x256xbf16>
    tpu.vector_store %arg8[%c20, %c0_25], %52 {strides = array<i32>} : memref<36x256xbf16, #tpu.memory_space<vmem>>, vector<4x256xbf16>,
    %c0_26 = arith.constant 0 : index
    %c32 = arith.constant 32 : index
    %54 = vector.load %arg7[%c0_26, %c32] : memref<4x290xbf16, #tpu.memory_space<vmem>>, vector<4x256xbf16>
    %55 = vector.broadcast %24 : vector<1x256xbf16> to vector<4x256xbf16>
    %56 = arith.mulf %54, %55 : vector<4x256xbf16>
    %c24 = arith.constant 24 : index
    %c0_27 = arith.constant 0 : index
    %57 = vector.load %arg8[%c24, %c0_27] : memref<36x256xbf16, #tpu.memory_space<vmem>>, vector<4x256xbf16>
    tpu.vector_store %arg8[%c24, %c0_27], %56 {strides = array<i32>} : memref<36x256xbf16, #tpu.memory_space<vmem>>, vector<4x256xbf16>,
    %c0_28 = arith.constant 0 : index
    %c33 = arith.constant 33 : index
    %58 = vector.load %arg7[%c0_28, %c33] : memref<4x290xbf16, #tpu.memory_space<vmem>>, vector<4x256xbf16>
    %c28 = arith.constant 28 : index
    %c0_29 = arith.constant 0 : index
    %59 = vector.load %arg8[%c28, %c0_29] : memref<36x256xbf16, #tpu.memory_space<vmem>>, vector<4x256xbf16>
    tpu.vector_store %arg8[%c28, %c0_29], %58 {strides = array<i32>} : memref<36x256xbf16, #tpu.memory_space<vmem>>, vector<4x256xbf16>,
    %c0_30 = arith.constant 0 : index
    %c34 = arith.constant 34 : index
    %60 = vector.load %arg7[%c0_30, %c34] : memref<4x290xbf16, #tpu.memory_space<vmem>>, vector<4x256xbf16>
    %61 = vector.broadcast %29 : vector<1x256xbf16> to vector<4x256xbf16>
    %62 = arith.mulf %60, %61 : vector<4x256xbf16>
    %c32_31 = arith.constant 32 : index
    %c0_32 = arith.constant 0 : index
    %63 = vector.load %arg8[%c32_31, %c0_32] : memref<36x256xbf16, #tpu.memory_space<vmem>>, vector<4x256xbf16>
    tpu.vector_store %arg8[%c32_31, %c0_32], %62 {strides = array<i32>} : memref<36x256xbf16, #tpu.memory_space<vmem>>, vector<4x256xbf16>,
    %c0_33 = arith.constant 0 : index
    %c0_34 = arith.constant 0 : index
    %64 = vector.load %arg2[%c0_33, %c0_34] : memref<4x36xbf16, #tpu.memory_space<vmem>>, vector<4x36xbf16>
    %c0_35 = arith.constant 0 : index
    %c0_36 = arith.constant 0 : index
    %65 = vector.load %arg8[%c0_35, %c0_36] : memref<36x256xbf16, #tpu.memory_space<vmem>>, vector<36x256xbf16>
    %cst_37 = arith.constant dense<0.000000e+00> : vector<4x256xf32>
    %66 = tpu.matmul %64, %65, %cst_37 {dimension_numbers = #tpu.dot_dimension_numbers<[1], [0], [0], [1], [0, 0, 1, 1], [], []>} : vector<4x36xbf16>, vector<36x256xbf16>, vector<4x256xf32> -> vector<4x256xf32>
    %c0_38 = arith.constant 0 : index
    %c0_39 = arith.constant 0 : index
    %67 = vector.load %arg3[%c0_38, %c0_39] : memref<4x1xf32, #tpu.memory_space<vmem>>, vector<4x1xf32>
    %68 = vector.broadcast %67 : vector<4x1xf32> to vector<4x256xf32>
    %69 = arith.addf %66, %68 : vector<4x256xf32>
    %cst_40 = arith.constant dense<0.000000e+00> : vector<4xf32>
    %70 = vector.multi_reduction <add>, %69, %cst_40 [1] : vector<4x256xf32> to vector<4xf32>
    %71 = vector.shape_cast %70 : vector<4xf32> to vector<4x1xf32>
    %cst_41 = arith.constant 3.906250e-03 : f32
    %72 = vector.broadcast %cst_41 : f32 to vector<4x1xf32>
    %73 = arith.mulf %71, %72 : vector<4x1xf32>
    %74 = vector.broadcast %73 : vector<4x1xf32> to vector<4x256xf32>
    %75 = arith.subf %69, %74 : vector<4x256xf32>
    %76 = arith.mulf %75, %75 : vector<4x256xf32>
    %cst_42 = arith.constant dense<0.000000e+00> : vector<4xf32>
    %77 = vector.multi_reduction <add>, %76, %cst_42 [1] : vector<4x256xf32> to vector<4xf32>
    %78 = vector.shape_cast %77 : vector<4xf32> to vector<4x1xf32>
    %cst_43 = arith.constant 3.906250e-03 : f32
    %79 = vector.broadcast %cst_43 : f32 to vector<4x1xf32>
    %80 = arith.mulf %78, %79 : vector<4x1xf32>
    %cst_44 = arith.constant 9.99999974E-6 : f32
    %81 = vector.broadcast %cst_44 : f32 to vector<4x1xf32>
    %82 = arith.addf %80, %81 : vector<4x1xf32>
    %83 = math.rsqrt %82 : vector<4x1xf32>
    %84 = vector.broadcast %83 : vector<4x1xf32> to vector<4x256xf32>
    %85 = arith.mulf %75, %84 : vector<4x256xf32>
    %cst_45 = arith.constant 0.000000e+00 : f32
    %86 = vector.broadcast %cst_45 : f32 to vector<4x256xf32>
    %87 = arith.cmpf ogt, %85, %86 : vector<4x256xf32>
    %cst_46 = arith.constant 2.000000e-01 : f32
    %88 = vector.broadcast %cst_46 : f32 to vector<4x256xf32>
    %89 = arith.mulf %88, %85 : vector<4x256xf32>
    %90 = arith.select %87, %85, %89 : vector<4x256xi1>, vector<4x256xf32>
    %91 = arith.truncf %90 : vector<4x256xf32> to vector<4x256xbf16>
    %c0_47 = arith.constant 0 : index
    %c17_48 = arith.constant 17 : index
    %92 = vector.load %arg7[%c0_47, %c17_48] : memref<4x290xbf16, #tpu.memory_space<vmem>>, vector<4x256xbf16>
    tpu.vector_store %arg7[%c0_47, %c17_48], %91 {strides = array<i32>} : memref<4x290xbf16, #tpu.memory_space<vmem>>, vector<4x256xbf16>,
    %c0_49 = arith.constant 0 : index
    %c0_50 = arith.constant 0 : index
    %93 = vector.load %arg7[%c0_49, %c0_50] : memref<4x290xbf16, #tpu.memory_space<vmem>>, vector<4x256xbf16>
    %94 = vector.broadcast %24 : vector<1x256xbf16> to vector<4x256xbf16>
    %95 = arith.mulf %93, %94 : vector<4x256xbf16>
    %c0_51 = arith.constant 0 : index
    %c0_52 = arith.constant 0 : index
    %96 = vector.load %arg8[%c0_51, %c0_52] : memref<36x256xbf16, #tpu.memory_space<vmem>>, vector<4x256xbf16>
    tpu.vector_store %arg8[%c0_51, %c0_52], %95 {strides = array<i32>} : memref<36x256xbf16, #tpu.memory_space<vmem>>, vector<4x256xbf16>,
    %c0_53 = arith.constant 0 : index
    %c1_54 = arith.constant 1 : index
    %97 = vector.load %arg7[%c0_53, %c1_54] : memref<4x290xbf16, #tpu.memory_space<vmem>>, vector<4x256xbf16>
    %c4_55 = arith.constant 4 : index
    %c0_56 = arith.constant 0 : index
    %98 = vector.load %arg8[%c4_55, %c0_56] : memref<36x256xbf16, #tpu.memory_space<vmem>>, vector<4x256xbf16>
    tpu.vector_store %arg8[%c4_55, %c0_56], %97 {strides = array<i32>} : memref<36x256xbf16, #tpu.memory_space<vmem>>, vector<4x256xbf16>,
    %c0_57 = arith.constant 0 : index
    %c2_58 = arith.constant 2 : index
    %99 = vector.load %arg7[%c0_57, %c2_58] : memref<4x290xbf16, #tpu.memory_space<vmem>>, vector<4x256xbf16>
    %100 = vector.broadcast %29 : vector<1x256xbf16> to vector<4x256xbf16>
    %101 = arith.mulf %99, %100 : vector<4x256xbf16>
    %c8_59 = arith.constant 8 : index
    %c0_60 = arith.constant 0 : index
    %102 = vector.load %arg8[%c8_59, %c0_60] : memref<36x256xbf16, #tpu.memory_space<vmem>>, vector<4x256xbf16>
    tpu.vector_store %arg8[%c8_59, %c0_60], %101 {strides = array<i32>} : memref<36x256xbf16, #tpu.memory_space<vmem>>, vector<4x256xbf16>,
    %c0_61 = arith.constant 0 : index
    %c16_62 = arith.constant 16 : index
    %103 = vector.load %arg7[%c0_61, %c16_62] : memref<4x290xbf16, #tpu.memory_space<vmem>>, vector<4x256xbf16>
    %104 = vector.broadcast %24 : vector<1x256xbf16> to vector<4x256xbf16>
    %105 = arith.mulf %103, %104 : vector<4x256xbf16>
    %c12_63 = arith.constant 12 : index
    %c0_64 = arith.constant 0 : index
    %106 = vector.load %arg8[%c12_63, %c0_64] : memref<36x256xbf16, #tpu.memory_space<vmem>>, vector<4x256xbf16>
    tpu.vector_store %arg8[%c12_63, %c0_64], %105 {strides = array<i32>} : memref<36x256xbf16, #tpu.memory_space<vmem>>, vector<4x256xbf16>,
    %c0_65 = arith.constant 0 : index
    %c17_66 = arith.constant 17 : index
    %107 = vector.load %arg7[%c0_65, %c17_66] : memref<4x290xbf16, #tpu.memory_space<vmem>>, vector<4x256xbf16>
    %c16_67 = arith.constant 16 : index
    %c0_68 = arith.constant 0 : index
    %108 = vector.load %arg8[%c16_67, %c0_68] : memref<36x256xbf16, #tpu.memory_space<vmem>>, vector<4x256xbf16>
    tpu.vector_store %arg8[%c16_67, %c0_68], %107 {strides = array<i32>} : memref<36x256xbf16, #tpu.memory_space<vmem>>, vector<4x256xbf16>,
    %c0_69 = arith.constant 0 : index
    %c18_70 = arith.constant 18 : index
    %109 = vector.load %arg7[%c0_69, %c18_70] : memref<4x290xbf16, #tpu.memory_space<vmem>>, vector<4x256xbf16>
    %110 = vector.broadcast %29 : vector<1x256xbf16> to vector<4x256xbf16>
    %111 = arith.mulf %109, %110 : vector<4x256xbf16>
    %c20_71 = arith.constant 20 : index
    %c0_72 = arith.constant 0 : index
    %112 = vector.load %arg8[%c20_71, %c0_72] : memref<36x256xbf16, #tpu.memory_space<vmem>>, vector<4x256xbf16>
    tpu.vector_store %arg8[%c20_71, %c0_72], %111 {strides = array<i32>} : memref<36x256xbf16, #tpu.memory_space<vmem>>, vector<4x256xbf16>,
    %c0_73 = arith.constant 0 : index
    %c32_74 = arith.constant 32 : index
    %113 = vector.load %arg7[%c0_73, %c32_74] : memref<4x290xbf16, #tpu.memory_space<vmem>>, vector<4x256xbf16>
    %114 = vector.broadcast %24 : vector<1x256xbf16> to vector<4x256xbf16>
    %115 = arith.mulf %113, %114 : vector<4x256xbf16>
    %c24_75 = arith.constant 24 : index
    %c0_76 = arith.constant 0 : index
    %116 = vector.load %arg8[%c24_75, %c0_76] : memref<36x256xbf16, #tpu.memory_space<vmem>>, vector<4x256xbf16>
    tpu.vector_store %arg8[%c24_75, %c0_76], %115 {strides = array<i32>} : memref<36x256xbf16, #tpu.memory_space<vmem>>, vector<4x256xbf16>,
    %c0_77 = arith.constant 0 : index
    %c33_78 = arith.constant 33 : index
    %117 = vector.load %arg7[%c0_77, %c33_78] : memref<4x290xbf16, #tpu.memory_space<vmem>>, vector<4x256xbf16>
    %c28_79 = arith.constant 28 : index
    %c0_80 = arith.constant 0 : index
    %118 = vector.load %arg8[%c28_79, %c0_80] : memref<36x256xbf16, #tpu.memory_space<vmem>>, vector<4x256xbf16>
    tpu.vector_store %arg8[%c28_79, %c0_80], %117 {strides = array<i32>} : memref<36x256xbf16, #tpu.memory_space<vmem>>, vector<4x256xbf16>,
    %c0_81 = arith.constant 0 : index
    %c34_82 = arith.constant 34 : index
    %119 = vector.load %arg7[%c0_81, %c34_82] : memref<4x290xbf16, #tpu.memory_space<vmem>>, vector<4x256xbf16>
    %120 = vector.broadcast %29 : vector<1x256xbf16> to vector<4x256xbf16>
    %121 = arith.mulf %119, %120 : vector<4x256xbf16>
    %c32_83 = arith.constant 32 : index
    %c0_84 = arith.constant 0 : index
    %122 = vector.load %arg8[%c32_83, %c0_84] : memref<36x256xbf16, #tpu.memory_space<vmem>>, vector<4x256xbf16>
    tpu.vector_store %arg8[%c32_83, %c0_84], %121 {strides = array<i32>} : memref<36x256xbf16, #tpu.memory_space<vmem>>, vector<4x256xbf16>,
    %c0_85 = arith.constant 0 : index
    %c0_86 = arith.constant 0 : index
    %123 = vector.load %arg4[%c0_85, %c0_86] : memref<4x36xbf16, #tpu.memory_space<vmem>>, vector<4x36xbf16>
    %c0_87 = arith.constant 0 : index
    %c0_88 = arith.constant 0 : index
    %124 = vector.load %arg8[%c0_87, %c0_88] : memref<36x256xbf16, #tpu.memory_space<vmem>>, vector<36x256xbf16>
    %cst_89 = arith.constant dense<0.000000e+00> : vector<4x256xf32>
    %125 = tpu.matmul %123, %124, %cst_89 {dimension_numbers = #tpu.dot_dimension_numbers<[1], [0], [0], [1], [0, 0, 1, 1], [], []>} : vector<4x36xbf16>, vector<36x256xbf16>, vector<4x256xf32> -> vector<4x256xf32>
    %c0_90 = arith.constant 0 : index
    %c0_91 = arith.constant 0 : index
    %126 = vector.load %arg5[%c0_90, %c0_91] : memref<4x1xf32, #tpu.memory_space<vmem>>, vector<4x1xf32>
    %127 = vector.broadcast %126 : vector<4x1xf32> to vector<4x256xf32>
    %128 = arith.addf %125, %127 : vector<4x256xf32>
    %cst_92 = arith.constant dense<0.000000e+00> : vector<4xf32>
    %129 = vector.multi_reduction <add>, %128, %cst_92 [1] : vector<4x256xf32> to vector<4xf32>
    %130 = vector.shape_cast %129 : vector<4xf32> to vector<4x1xf32>
    %cst_93 = arith.constant 3.906250e-03 : f32
    %131 = vector.broadcast %cst_93 : f32 to vector<4x1xf32>
    %132 = arith.mulf %130, %131 : vector<4x1xf32>
    %133 = vector.broadcast %132 : vector<4x1xf32> to vector<4x256xf32>
    %134 = arith.subf %128, %133 : vector<4x256xf32>
    %135 = arith.mulf %134, %134 : vector<4x256xf32>
    %cst_94 = arith.constant dense<0.000000e+00> : vector<4xf32>
    %136 = vector.multi_reduction <add>, %135, %cst_94 [1] : vector<4x256xf32> to vector<4xf32>
    %137 = vector.shape_cast %136 : vector<4xf32> to vector<4x1xf32>
    %cst_95 = arith.constant 3.906250e-03 : f32
    %138 = vector.broadcast %cst_95 : f32 to vector<4x1xf32>
    %139 = arith.mulf %137, %138 : vector<4x1xf32>
    %cst_96 = arith.constant 9.99999974E-6 : f32
    %140 = vector.broadcast %cst_96 : f32 to vector<4x1xf32>
    %141 = arith.addf %139, %140 : vector<4x1xf32>
    %142 = math.rsqrt %141 : vector<4x1xf32>
    %143 = vector.broadcast %142 : vector<4x1xf32> to vector<4x256xf32>
    %144 = arith.mulf %134, %143 : vector<4x256xf32>
    %c0_97 = arith.constant 0 : index
    %c0_98 = arith.constant 0 : index
    %c0_99 = arith.constant 0 : index
    %145 = vector.load %arg1[%c0_97, %c0_98, %c0_99] : memref<1x4x256xf32, #tpu.memory_space<vmem>>, vector<1x4x256xf32>
    %146 = vector.shape_cast %145 : vector<1x4x256xf32> to vector<4x256xf32>
    %147 = arith.addf %146, %144 : vector<4x256xf32>
    %c0_100 = arith.constant 0 : index
    %c0_101 = arith.constant 0 : index
    %c0_102 = arith.constant 0 : index
    %148 = vector.load %arg6[%c0_100, %c0_101, %c0_102] : memref<1x4x256xf32, #tpu.memory_space<vmem>>, vector<1x4x256xf32>
    %149 = vector.shape_cast %148 : vector<1x4x256xf32> to vector<4x256xf32>
    %150 = vector.shape_cast %147 : vector<4x256xf32> to vector<1x4x256xf32>
    tpu.vector_store %arg6[%c0_100, %c0_101, %c0_102], %150 {strides = array<i32>} : memref<1x4x256xf32, #tpu.memory_space<vmem>>, vector<1x4x256xf32>,
    return
  }
  func.func @transform_0(%arg0: i32) -> (i32, i32, i32) {
    %c0_i32 = arith.constant 0 : i32
    %c0_i32_0 = arith.constant 0 : i32
    %c0_i32_1 = arith.constant 0 : i32
    return %arg0, %c0_i32, %c0_i32_0 : i32, i32, i32
  }
  func.func @transform_1(%arg0: i32) -> (i32, i32) {
    %c0_i32 = arith.constant 0 : i32
    %c0_i32_0 = arith.constant 0 : i32
    %c0_i32_1 = arith.constant 0 : i32
    return %c0_i32, %c0_i32_0 : i32, i32
  }
  func.func @transform_2(%arg0: i32) -> (i32, i32) {
    %c0_i32 = arith.constant 0 : i32
    %c0_i32_0 = arith.constant 0 : i32
    %c0_i32_1 = arith.constant 0 : i32
    return %c0_i32, %c0_i32_0 : i32, i32
  }
  func.func @transform_3(%arg0: i32) -> (i32, i32) {
    %c0_i32 = arith.constant 0 : i32
    %c0_i32_0 = arith.constant 0 : i32
    %c0_i32_1 = arith.constant 0 : i32
    return %c0_i32, %c0_i32_0 : i32, i32
  }
  func.func @transform_4(%arg0: i32) -> (i32, i32) {
    %c0_i32 = arith.constant 0 : i32
    %c0_i32_0 = arith.constant 0 : i32
    %c0_i32_1 = arith.constant 0 : i32
    return %c0_i32, %c0_i32_0 : i32, i32
  }
  func.func @transform_5(%arg0: i32) -> (i32, i32, i32) {
    %c0_i32 = arith.constant 0 : i32
    %c0_i32_0 = arith.constant 0 : i32
    %c0_i32_1 = arith.constant 0 : i32
    return %arg0, %c0_i32, %c0_i32_0 : i32, i32, i32
  }
}

</mosaic_0001>

<bundles_post_ra>
// kernel: residual_block.1
= control target key start
LH: loop header
LB: loop body
LE: loop exit
PB: predicated region body
PF: predicated region fallthrough
CT: control target
= control target key end

     0   :  { %s1278_s18 = smov 0   ;;  %s1474_s0 = inlined_call_operand.vmem [shape: f32[2,4,256], index: 0, kind: input, shape index: {}]   ;;  %s1475_s1 = inlined_call_operand.vmem [shape: bf16[4,36], index: 1, kind: input, shape index: {}]   ;;  %s1476_s2 = inlined_call_operand.vmem [shape: f32[4,1], index: 2, kind: input, shape index: {}]   ;;  %s1477_s3 = inlined_call_operand.vmem [shape: bf16[4,36], index: 3, kind: input, shape index: {}]   ;;  %s1478_s4 = inlined_call_operand.vmem [shape: f32[4,1], index: 4, kind: input, shape index: {}]   ;;  %s1479_s5 = inlined_call_operand.vmem [shape: f32[2,4,256], index: 5, kind: output, shape index: {}]  }
   0x1 LB: > { %s1130_s19 = sadd.s32 4294967295, %s1229_s18   ;;  %p1134_p0 = scmp.ge.s32.totalorder %s1229_s18, 1  ;;  %s1229_s18 = sphi %s1278_s18, %s15_s18  }
   0x2   : > { %p187_p1 = scmp.lt.s32.totalorder %s1229_s18, 3 }
   0x4   : > { %p188_p2 = pnand %p1134_p0, %p187_p1 }
   0x5   : > { %p215_p3 = scmp.lt.s32.totalorder (!%p188_p2), %s1130_s19, 1  ;;  %v230_v0 = vlaneseq (!%p188_p2)  ;;  %vm226_vm0 = vcmask (!%p188_p2), 132096   ;;  %v1231_v1 = vmov (!%p188_p2), 1983009808   ;;  %vm228_vm1 = vcmask (!%p188_p2), 271496   ;;  %s1234_s24 = smov (!%p188_p2), 17  }
   0x6   : > { %191 = sbr.rel (%p188_p2) target bundleno = 1671 (0x687), region = 40  ;;  %v283_v2 = vunpack.c.l.s4 (!%p188_p2), %v1231_v1  ;;  %v1232_v4 = vmov (!%p188_p2), 0   ;;  %v1233_v13 = vmov (!%p188_p2), 0.0   ;;  %s1235_s25 = smov (!%p188_p2), 16   ;;  %vm295_vm6 = vcmask (!%p188_p2), 1041544  }
   0x7   : > { %v231_v3 = vand.u32 (!%p188_p2), 127, %v230_v0  ;;  %227 = vst.msk [vmem:[#allocation2] sm:$0x3] (!%p188_p2), %vm226_vm0, %v1232_v4  ;;  %674 = vmatprep.mubr.bf16.mxu0 (!%p188_p2), %v1232_v4  ;;  %1194 = vset.pattern.permute.xlu0 (!%p188_p2), %v1232_v4  ;;  %v286_v6 = vshrl.u32 (!%p188_p2), %v230_v0, 7  ;;  %s1236_s26 = smov (!%p188_p2), 2   ;;  %s1237_s27 = smov (!%p188_p2), 18  }
   0x8   : > { %229 = vst.msk [vmem:[#allocation2 + $0x4] sm:$0x3] (!%p188_p2), %vm228_vm1, %v1232_v4  ;;  %v284_v5 = vunpack.c.0.s8 (!%p188_p2), %v283_v2  ;;  %1039 = vmatprep.mubr.bf16.mxu1 (!%p188_p2), %v1232_v4  ;;  %1195 = vset.pattern.permute.xlu1 (!%p188_p2), %v1232_v4  ;;  %s1238_s28 = smov (!%p188_p2), 32   ;;  %s1239_s29 = smov (!%p188_p2), 34   ;;  %vm296_vm7 = vcmask (!%p188_p2), 1043458   ;;  %vm298_vm9 = vcmask (!%p188_p2), 136196  }
   0x9   : > { %v232_v7 = vadd.s32 (!%p188_p2), 128, %v231_v3  ;;  %v237_v8 = vand.u32 (!%p188_p2), 15, %v231_v3  ;;  %vm297_vm8 = vmor (!%p188_p2), %vm296_vm7, %vm295_vm6  ;;  %vm292_vm10 = vcmask (!%p188_p2), 138240   ;;  %vm367_vm12 = vcmask (!%p188_p2), 15360   ;;  %s1240_s30 = smov (!%p188_p2), 111   ;;  %s1241_s6 = smov (!%p188_p2), 127  }
   0xa   : > { %v1298_v12 = vsub.s32 (!%p188_p2), %v284_v5, %v286_v6  ;;  %vm1309_vm11 = vmor (!%p188_p2), %vm298_vm9, %vm297_vm8  ;;  %vm402_vm13 = vcmask (!%p188_p2), 130048   ;;  %vm500_vm14 = vcmask (!%p188_p2), 261120   ;;  %vm465_vm15 = vcmask (!%p188_p2), 146432   ;;  %s1242_s7 = smov (!%p188_p2), 95   ;;  %s1243_s8 = smov (!%p188_p2), 126  }
   0xb   : > { %v244_v10 = vand.u32 (!%p188_p2), 15, %v232_v7  ;;  %vm257_vm2 = vcmp.ne.s32.totalorder (!%p188_p2), %v237_v8, 0  ;;  %vm265_vm3 = vcmp.ne.s32.totalorder (!%p188_p2), %v237_v8, 15  ;;  %s1244_s9 = smov (!%p188_p2), 112   ;;  %s1245_s10 = smov (!%p188_p2), 96   ;;  %vm563_vm0 = vcmask (!%p188_p2), 277504  }
   0xc   : > { %v1139_v14 = vsel (!%p188_p2), %vm257_vm2, 1.0, %v1233_v13  ;;  %v1141_v15 = vsel (!%p188_p2), %vm265_vm3, 1.0, %v1233_v13  ;;  %s1246_s11 = smov (!%p188_p2), 110   ;;  %s1247_s12 = smov (!%p188_p2), 94   ;;  %vm347_vm1 = vcmask (!%p188_p2), 1043456   ;;  %vm349_vm2 = vcmask (!%p188_p2), 1039360  }
   0xd   : > { %s1483_s19 = smov (!%p215_p3, %s1130_s19), 1  ;;  %vm258_vm4 = vcmp.ne.s32.totalorder %v244_v10, 0  ;;  %vm266_vm5 = vcmp.ne.s32.totalorder %v244_v10, 15  ;;  %vm457_vm3 = vcmask 908288   ;;  %vm394_vm6 = vcmask 1031168  }
   0xe   : > { %s1167_s20 = sshll.u32 %s1483_s19, 3  ;;  %v1140_v17 = vsel %vm258_vm4, 1.0, %v1233_v13  ;;  %v1142_v18 = vsel %vm266_vm5, 1.0, %v1233_v13  ;;  %vm555_vm4 = vcmask 777216   ;;  %vm429_vm5 = vcmask 916480  }
   0xf   : > { %s219_s23 = scalar_lea.vmem %s1474_s0, %s1167_s20  ;;  %v1144_v19 = vpack.c.bf16 %v1140_v17, %v1139_v14  ;;  %v1146_v20 = vpack.c.bf16 %v1142_v18, %v1141_v15  ;;  %vm492_vm7 = vcmask 900096   ;;  %vm527_vm8 = vcmask 785408  }
  0x10   : > { %v1294_v9 = vld [vmem:[%s219_s23] sm:$0xff]  ;;  %vm590_vm9 = vcmask 769024  }
  0x11   : > { %v275_v11 = vcombine.high %v1294_v9, %v1294_v9  ;;  %v1303_v22 = vrot.slane %v1144_v19, %v1298_v12  ;;  %v363_v23 = vrot.slane %v1146_v20, %v1298_v12  ;;  %v600_v20 = vld [vmem:[%s1476_s2] sm:$0xf] }
  0x13   : > { %v1143_v16 = vpack.c.bf16 %v275_v11, %v1294_v9  ;;  %399 = vrot.lane.b32.xlu1 %v1303_v22, %s1235_s25 }
  0x15   : > { %v288_v21 = vrot.slane %v1143_v16, %v1298_v12 }
  0x17   : > { %289 = vrot.lane.b32.xlu0 %v288_v21, %s1234_s24  ;;  %462 = vrot.lane.b32.xlu1 %v363_v23, %s1237_s27 }
  0x1b   : > { %364 = vrot.lane.b32.xlu0 %v363_v23, %s1236_s26  ;;  %560 = vrot.lane.b32.xlu1 %v363_v23, %s1239_s29  ;;  %s224_s26 = scalar_lea.vmem %s1479_s5, %s1167_s20 }
  0x1f   : > { %497 = vrot.lane.b32.xlu0 %v1303_v22, %s1238_s28 }
  0x85   : > { %v400_v29 = vpop.permute.xlu1 %399 }
  0x86   : > { %v401_v31 = vrot.slane %v400_v29, 6 }
  0x88   : > { %v1320_v41 = vsel %vm402_vm13, %v401_v31, %v400_v29  ;;  %vm631_vm13 = vcmask 293888  }
  0x89   : > { %v290_v24 = vpop.permute.xlu0 %289  ;;  %v463_v48 = vpop.permute.xlu1 %462 }
  0x8a   : > { %v291_v26 = vrot.slane %v290_v24, 6  ;;  %v464_v52 = vrot.slane %v463_v48, 6 }
  0x8c   : > { %v293_v27 = vsel %vm292_vm10, %v291_v26, %v290_v24  ;;  %v1336_v59 = vsel %vm465_vm15, %v464_v52, %v463_v48 }
  0x8d   : > { %300 = vst.msk [vmem:[#allocation2] sm:$0x3f] %vm1309_vm11, %v293_v27  ;;  %v365_v28 = vpop.permute.xlu0 %364  ;;  %v561_v60 = vpop.permute.xlu1 %560 }
  0x8e   : > { %v366_v30 = vrot.slane %v365_v28, 6  ;;  %v562_v1 = vrot.slane %v561_v60, 6 }
  0x90   : > { %v1317_v37 = vsel %vm367_vm12, %v366_v30, %v365_v28  ;;  %v1347_v7 = vsel %vm563_vm0, %v562_v1, %v561_v60  ;;  %vm635_vm12 = vcmask 1041408  }
  0x91   : > { %v498_v32 = vpop.permute.xlu0 %497 }
  0x92   : > { %v499_v38 = vrot.slane %v498_v32, 6 }
  0x94   : > { %v433_v33 = vld [vmem:[#allocation2] sm:$0x3f]  ;;  %v1327_v50 = vsel %vm500_vm14, %v499_v38, %v498_v32 }
  0x95   : > { %v442_v34 = vrot.slane %v433_v33, %v1298_v12  ;;  %v324_v35 = vld [vmem:[#allocation2] sm:$0x3f]  ;;  %v435_v57 = vcombine.high %v433_v33, %v433_v33 }
  0x96   : > { %v353_v36 = vld [vmem:[#allocation2] sm:$0x3f]  ;;  %v340_v39 = vrot.slane %v324_v35, %v1298_v12  ;;  %v326_v43 = vcombine.low %v324_v35, %v324_v35 }
  0x97   : > { %v398_v40 = vld [vmem:[#allocation2] sm:$0x3f]  ;;  %450 = vrot.lane.b32.xlu0 %v442_v34, %s1240_s30  ;;  %v370_v44 = vmul.bf16 %v1317_v37, %v353_v36  ;;  %v449_v0 = vrot.slane %v435_v57, %v1298_v12 }
  0x98   : > { %v531_v42 = vld [vmem:[#allocation2] sm:$0x3f]  ;;  %343 = vrot.lane.b32.xlu1 %v340_v39, %s1241_s6  ;;  %v333_v45 = vrot.slane %v326_v43, %v1298_v12  ;;  %v405_v47 = vmul.bf16 %v1320_v41, %v398_v40 }
  0x99   : > { %v301_v46 = vld [vmem:[#allocation2] sm:$0xf]  ;;  %v547_v51 = vrot.slane %v531_v42, %v1298_v12  ;;  %v379_v55 = vrot.slane %v370_v44, %v1298_v12  ;;  %v533_v62 = vcombine.low %v531_v42, %v531_v42  ;;  %v372_v4 = vcombine.high %v370_v44, %v370_v44 }
  0x9a   : > { %v496_v49 = vld [vmem:[#allocation2] sm:$0x3f]  ;;  %v313_v53 = vmul.bf16 %v1303_v22, %v301_v46  ;;  %v421_v56 = vrot.slane %v405_v47, %v1298_v12  ;;  %v407_v2 = vcombine.low %v405_v47, %v405_v47 }
  0x9b   : > { %341 = vrot.lane.b32.xlu0 %v333_v45, %s1241_s6  ;;  %v503_v54 = vmul.bf16 %v1327_v50, %v496_v49  ;;  %v461_v58 = vld [vmem:[#allocation2] sm:$0x3f]  ;;  %v540_v3 = vrot.slane %v533_v62, %v1298_v12  ;;  %v386_v14 = vrot.slane %v372_v4, %v1298_v12 }
  0x9c   : > { %550 = vrot.lane.b32.xlu1 %v547_v51, %s1242_s7  ;;  %1145 = vst.sshfl [vmem:[#allocation3] sm:$0xf pattern:$0x76325410] %v313_v53  ;;  %v468_v63 = vmul.bf16 %v1336_v59, %v461_v58  ;;  %v559_v6 = vld [vmem:[#allocation2] sm:$0x3f]  ;;  %v414_v10 = vrot.slane %v407_v2, %v1298_v12 }
  0x9d   : > { %v512_v61 = vrot.slane %v503_v54, %v1298_v12  ;;  %v505_v11 = vcombine.high %v503_v54, %v503_v54  ;;  %v566_v13 = vmul.bf16 %v1347_v7, %v559_v6 }
  0x9e   : > { %v484_v5 = vrot.slane %v468_v63, %v1298_v12  ;;  %v470_v8 = vcombine.low %v468_v63, %v468_v63 }
  0x9f   : > { %387 = vrot.lane.b32.xlu0 %v379_v55, %s1243_s8  ;;  %v568_v16 = vcombine.high %v566_v13, %v566_v13  ;;  %v519_v17 = vrot.slane %v505_v11, %v1298_v12  ;;  %v575_v18 = vrot.slane %v566_v13, %v1298_v12 }
  0xa0   : > { %424 = vrot.lane.b32.xlu1 %v421_v56, %s1244_s9  ;;  %v477_v15 = vrot.slane %v470_v8, %v1298_v12 }
  0xa1   : > { %v582_v19 = vrot.slane %v568_v16, %v1298_v12 }
  0xa3   : > { %520 = vrot.lane.b32.xlu0 %v512_v61, %s1245_s10 }
  0xa4   : > { %452 = vrot.lane.b32.xlu1 %v449_v0, %s1240_s30 }
  0xa7   : > { %548 = vrot.lane.b32.xlu0 %v540_v3, %s1242_s7 }
  0xa8   : > { %487 = vrot.lane.b32.xlu1 %v484_v5, %s1246_s11 }
  0xab   : > { %422 = vrot.lane.b32.xlu0 %v414_v10, %s1244_s9 }
  0xac   : > { %389 = vrot.lane.b32.xlu1 %v386_v14, %s1243_s8 }
  0xaf   : > { %485 = vrot.lane.b32.xlu0 %v477_v15, %s1246_s11 }
  0xb0   : > { %522 = vrot.lane.b32.xlu1 %v519_v17, %s1245_s10 }
  0xb3   : > { %583 = vrot.lane.b32.xlu0 %v575_v18, %s1247_s12 }
  0xb4   : > { %585 = vrot.lane.b32.xlu1 %v582_v19, %s1247_s12 }
  0xb7   : > { %603 = vperm.xlu0 %1194, %v600_v20  }
 0x109   : > { %v451_v21 = vpop.permute.xlu0 %450 }
 0x10a   : > { %v344_v23 = vpop.permute.xlu1 %343  ;;  %v454_v35 = vrot.slane %v451_v21, 4 }
 0x10b   : > { %v346_v26 = vrot.slane %v344_v23, 4  ;;  %v594_v23 = vld [vmem:[%s1475_s1] sm:$0x3] }
 0x10d   : > { %v342_v24 = vpop.permute.xlu0 %341 }
 0x10e   : > { %v551_v27 = vpop.permute.xlu1 %550  ;;  %v345_v28 = vrot.slane %v342_v24, 4 }
 0x10f   : > { %v553_v40 = vrot.slane %v551_v27, 4 }
 0x110   : > { %v348_v29 = vsel %vm347_vm1, %v345_v28, %v346_v26 }
 0x111   : > { %v350_v30 = vsel %vm349_vm2, %v342_v24, %v348_v29  ;;  %v388_v31 = vpop.permute.xlu0 %387 }
 0x112   : > { %352 = vst [vmem:[#allocation3] sm:$0xcc] %v350_v30  ;;  %v425_v32 = vpop.permute.xlu1 %424  ;;  %v391_v52 = vrot.slane %v388_v31, 4 }
 0x113   : > { %v427_v48 = vrot.slane %v425_v32, 4 }
 0x115   : > { %v521_v33 = vpop.permute.xlu0 %520 }
 0x116   : > { %v453_v34 = vpop.permute.xlu1 %452  ;;  %v524_v63 = vrot.slane %v521_v33, 4 }
 0x117   : > { %v455_v36 = vrot.slane %v453_v34, 4 }
 0x119   : > { %v456_v38 = vsel %vm347_vm1, %v454_v35, %v455_v36  ;;  %v549_v39 = vpop.permute.xlu0 %548 }
 0x11a   : > { %v458_v42 = vsel %vm457_vm3, %v451_v21, %v456_v38  ;;  %v488_v43 = vpop.permute.xlu1 %487  ;;  %v552_v44 = vrot.slane %v549_v39, 4 }
 0x11b   : > { %460 = vst [vmem:[#allocation3 + $0x10] sm:$0x33] %v458_v42  ;;  %v490_v58 = vrot.slane %v488_v43, 4 }
 0x11c   : > { %v554_v45 = vsel %vm347_vm1, %v552_v44, %v553_v40 }
 0x11d   : > { %v556_v46 = vsel %vm555_vm4, %v549_v39, %v554_v45  ;;  %v423_v47 = vpop.permute.xlu0 %422 }
 0x11e   : > { %558 = vst [vmem:[#allocation3 + $0x18] sm:$0xcc] %v556_v46  ;;  %v390_v49 = vpop.permute.xlu1 %389  ;;  %v426_v51 = vrot.slane %v423_v47, 4 }
 0x11f   : > { %v392_v53 = vrot.slane %v390_v49, 4 }
 0x120   : > { %v428_v54 = vsel %vm347_vm1, %v426_v51, %v427_v48 }
 0x121   : > { %v393_v55 = vsel %vm347_vm1, %v391_v52, %v392_v53  ;;  %v430_v56 = vsel %vm429_vm5, %v423_v47, %v428_v54  ;;  %v486_v57 = vpop.permute.xlu0 %485 }
 0x122   : > { %v395_v60 = vsel %vm394_vm6, %v388_v31, %v393_v55  ;;  %432 = vst [vmem:[#allocation3 + $0x8] sm:$0xcc] %v430_v56  ;;  %v523_v61 = vpop.permute.xlu1 %522  ;;  %v489_v62 = vrot.slane %v486_v57, 4 }
 0x123   : > { %397 = vst [vmem:[#allocation3 + $0x8] sm:$0x33] %v395_v60  ;;  %v525_v0 = vrot.slane %v523_v61, 4 }
 0x124   : > { %v491_v1 = vsel %vm347_vm1, %v489_v62, %v490_v58 }
 0x125   : > { %v526_v2 = vsel %vm347_vm1, %v524_v63, %v525_v0  ;;  %v493_v3 = vsel %vm492_vm7, %v486_v57, %v491_v1  ;;  %v584_v4 = vpop.permute.xlu0 %583 }
 0x126   : > { %v528_v5 = vsel %vm527_vm8, %v521_v33, %v526_v2  ;;  %495 = vst [vmem:[#allocation3 + $0x10] sm:$0xcc] %v493_v3  ;;  %v586_v6 = vpop.permute.xlu1 %585  ;;  %v587_v8 = vrot.slane %v584_v4, 4 }
 0x127   : > { %530 = vst [vmem:[#allocation3 + $0x18] sm:$0x33] %v528_v5  ;;  %v588_v10 = vrot.slane %v586_v6, 4 }
 0x129   : > { %v589_v11 = vsel %vm347_vm1, %v587_v8, %v588_v10 }
 0x12a   : > { %v591_v13 = vsel %vm590_vm9, %v584_v4, %v589_v11  ;;  %v1200_v14 = vld [vmem:[#allocation3 + $0x4] ss:$8 sps:$4 sm:$0xff]   ;;  %v1202_v15 = vld [vmem:[#allocation3] ss:$8 sps:$4 sm:$0xff]  }
 0x12b   : > { %593 = vst [vmem:[#allocation3 + $0x20] sm:$0x33] %v591_v13  ;;  %642 = vmatprep.subr.bf16.mxu0 %v1200_v14 }
 0x12c   : > { %643 = vmatpush1.bf16.msra.mxu0 %v1202_v15 }
 0x12e   : > { %v1203_v16 = vld [vmem:[#allocation3 + $0x14] ss:$8 sps:$4 sm:$0xff]   ;;  %v1205_v17 = vld [vmem:[#allocation3 + $0x10] ss:$8 sps:$4 sm:$0xff]  }
 0x12f   : > { %644 = vmatprep.subr.bf16.mxu0 %v1203_v16 }
 0x130   : > { %645 = vmatpush1.bf16.msra.mxu0 %v1205_v17 }
 0x132   : > { %v599_v18 = vld [vmem:[#allocation3 + $0x20] sm:$0x33] }
 0x133   : > { %v1152_v19 = vcombine.high %v599_v18, %v599_v18  ;;  %v1151_v20 = vcombine.low %v599_v18, %v599_v18 }
 0x135   : > { %1153 = vmatprep.subr.msk.bf16.mxu0 %vm635_vm12, %v1152_v19  ;;  %v637_v21 = vsel %vm635_vm12, %v1151_v20, 0 }
 0x136   : > { %647 = vmatpush1.bf16.msra.mxu0 %v637_v21  ;;  %v604_v24 = vpop.permute.xlu0 %603 }
 0x139   : > { %1154 = vmatmul.mubr.msk.bf16.vlgmr.msra.gmra.mrb[0].mxu0 %vm631_vm13, %v594_v23 }
 0x20c   : > { %v676_v26 = vpop.f32.mrb[0].mxu0 }
 0x20d   : > { %v677_v27 = vadd.f32 %v676_v26, %v604_v24  ;;  %v678_v28 = vpop.f32.mrb[1].mxu0 }
 0x20e   : > { %v679_v29 = vadd.f32 %v678_v28, %v604_v24  ;;  %v680_v30 = vpop.f32.mrb[2].mxu0 }
 0x20f   : > { %v681_v31 = vpop.f32.mrb[3].mxu0  ;;  %v684_v32 = vsel %vm347_vm1, %v677_v27, 0.0 }
 0x210   : > { %v685_v33 = vsel %vm347_vm1, %v679_v29, 0.0 }
 0x211   : > { %v686_v34 = vadd.f32 %v685_v33, %v684_v32 }
 0x213   : > { %687 = vadd.xlane.f32.xlu1 %v686_v34 }
 0x2a0   : > { %v688_v35 = vpop.xlane.xlu1 %687 }
 0x2a1   : > { %v689_v36 = vmul.f32 0.00390625, %v688_v35 }
 0x2a3   : > { %v690_v38 = vsub.f32 %v677_v27, %v689_v36  ;;  %v691_v39 = vsub.f32 %v679_v29, %v689_v36 }
 0x2a5   : > { %v692_v40 = vmul.f32 %v690_v38, %v690_v38  ;;  %v693_v42 = vmul.f32 %v691_v39, %v691_v39 }
 0x2a7   : > { %v694_v43 = vsel %vm347_vm1, %v692_v40, 0.0  ;;  %v695_v44 = vsel %vm347_vm1, %v693_v42, 0.0 }
 0x2a8   : > { %v696_v45 = vadd.f32 %v695_v44, %v694_v43 }
 0x2aa   : > { %697 = vadd.xlane.f32.xlu0 %v696_v45 }
 0x337   : > { %v698_v46 = vpop.xlane.xlu0 %697 }
 0x338   : > { %v699_v47 = vmul.f32 0.00390625, %v698_v46 }
 0x33a   : > { %v700_v48 = vadd.f32 1e-05, %v699_v47 }
 0x33c   : > { %1219 = vrsqrt.f32 %v700_v48 }
 0x346   : > { %v1220_v49 = vpop.eup %1219 }
 0x347   : > { %v702_v51 = vmul.f32 %v1220_v49, %v690_v38  ;;  %v703_v52 = vmul.f32 %v1220_v49, %v691_v39 }
 0x349   : > { %vm704_vm14 = vcmp.gt.f32.partialorder %v702_v51, 0.0  ;;  %vm705_vm15 = vcmp.gt.f32.partialorder %v703_v52, 0.0  ;;  %v706_v53 = vmul.f32 0.2, %v702_v51  ;;  %v707_v54 = vmul.f32 0.2, %v703_v52 }
 0x34b   : > { %v708_v55 = vsel %vm704_vm14, %v702_v51, %v706_v53  ;;  %v709_v56 = vsel %vm705_vm15, %v703_v52, %v707_v54 }
 0x34c   : > { %v1155_v57 = vpack.c.bf16 %v709_v56, %v708_v55 }
 0x34e   : > { %v721_v58 = vrot.slane %v1155_v57, %v1298_v12 }
 0x350   : > { %722 = vrot.lane.b32.xlu1 %v721_v58, %s1234_s24 }
 0x3c2   : > { %v723_v60 = vpop.permute.xlu1 %722 }
 0x3c3   : > { %v724_v61 = vrot.slane %v723_v60, 6 }
 0x3c5   : > { %v725_v62 = vsel %vm292_vm10, %v724_v61, %v723_v60 }
 0x3c6   : > { %727 = vst.msk [vmem:[#allocation2] sm:$0x3f] %vm1309_vm11, %v725_v62 }
 0x3cd   : > { %v906_v63 = vld [vmem:[#allocation2] sm:$0x3f] }
 0x3ce   : > { %v740_v0 = vld [vmem:[#allocation2] sm:$0x3f]  ;;  %v922_v1 = vrot.slane %v906_v63, %v1298_v12 }
 0x3cf   : > { %v756_v2 = vrot.slane %v740_v0, %v1298_v12  ;;  %v742_v3 = vcombine.low %v740_v0, %v740_v0  ;;  %v823_v4 = vld [vmem:[#allocation2] sm:$0x3f] }
 0x3d0   : > { %v767_v5 = vld [vmem:[#allocation2] sm:$0x3f]  ;;  %925 = vrot.lane.b32.xlu0 %v922_v1, %s1242_s7  ;;  %v832_v10 = vrot.slane %v823_v4, %v1298_v12  ;;  %v825_v19 = vcombine.high %v823_v4, %v823_v4 }
 0x3d1   : > { %v795_v6 = vld [vmem:[#allocation2] sm:$0x3f]  ;;  %759 = vrot.lane.b32.xlu1 %v756_v2, %s1241_s6  ;;  %v749_v25 = vrot.slane %v742_v3, %v1298_v12  ;;  %v768_v11 = vmul.bf16 %v767_v5, %v1317_v37 }
 0x3d2   : > { %v728_v8 = vld [vmem:[#allocation2] sm:$0xf]  ;;  %v796_v13 = vmul.bf16 %v795_v6, %v1320_v41  ;;  %v908_v41 = vcombine.low %v906_v63, %v906_v63 }
 0x3d3   : > { %v878_v14 = vld [vmem:[#allocation2] sm:$0x3f]  ;;  %v729_v15 = vmul.bf16 %v728_v8, %v1303_v22  ;;  %v777_v16 = vrot.slane %v768_v11, %v1298_v12  ;;  %v839_v22 = vrot.slane %v825_v19, %v1298_v12  ;;  %v770_v26 = vcombine.high %v768_v11, %v768_v11 }
 0x3d4   : > { %757 = vrot.lane.b32.xlu0 %v749_v25, %s1241_s6  ;;  %v812_v17 = vrot.slane %v796_v13, %v1298_v12  ;;  %v879_v18 = vmul.bf16 %v878_v14, %v1327_v50  ;;  %v850_v20 = vld [vmem:[#allocation2] sm:$0x3f]  ;;  %v915_v23 = vrot.slane %v908_v41, %v1298_v12  ;;  %v798_v24 = vcombine.low %v796_v13, %v796_v13 }
 0x3d5   : > { %840 = vrot.lane.b32.xlu1 %v832_v10, %s1240_s30  ;;  %1156 = vst.sshfl [vmem:[#allocation3] sm:$0xf pattern:$0x76325410] %v729_v15  ;;  %v851_v21 = vmul.bf16 %v850_v20, %v1336_v59  ;;  %v933_v27 = vld [vmem:[#allocation2] sm:$0x3f]  ;;  %v784_v59 = vrot.slane %v770_v26, %v1298_v12 }
 0x3d6   : > { %v888_v37 = vrot.slane %v879_v18, %v1298_v12  ;;  %v805_v29 = vrot.slane %v798_v24, %v1298_v12  ;;  %v881_v30 = vcombine.high %v879_v18, %v879_v18  ;;  %v934_v31 = vmul.bf16 %v933_v27, %v1347_v7  ;;  %v967_v7 = vld [vmem:[%s1478_s4] sm:$0xf] }
 0x3d7   : > { %v867_v50 = vrot.slane %v851_v21, %v1298_v12  ;;  %v853_v28 = vcombine.low %v851_v21, %v851_v21 }
 0x3d8   : > { %815 = vrot.lane.b32.xlu0 %v812_v17, %s1244_s9  ;;  %v895_v33 = vrot.slane %v881_v30, %v1298_v12  ;;  %v936_v34 = vcombine.high %v934_v31, %v934_v31  ;;  %v943_v35 = vrot.slane %v934_v31, %v1298_v12  ;;  %v961_v31 = vld [vmem:[%s1477_s3] sm:$0x3] }
 0x3d9   : > { %785 = vrot.lane.b32.xlu1 %v777_v16, %s1243_s8  ;;  %v860_v32 = vrot.slane %v853_v28, %v1298_v12 }
 0x3da   : > { %v950_v36 = vrot.slane %v936_v34, %v1298_v12 }
 0x3dc   : > { %842 = vrot.lane.b32.xlu0 %v839_v22, %s1240_s30 }
 0x3dd   : > { %896 = vrot.lane.b32.xlu1 %v888_v37, %s1245_s10 }
 0x3e0   : > { %870 = vrot.lane.b32.xlu0 %v867_v50, %s1246_s11 }
 0x3e1   : > { %923 = vrot.lane.b32.xlu1 %v915_v23, %s1242_s7 }
 0x3e4   : > { %787 = vrot.lane.b32.xlu0 %v784_v59, %s1243_s8 }
 0x3e5   : > { %813 = vrot.lane.b32.xlu1 %v805_v29, %s1244_s9 }
 0x3e8   : > { %898 = vrot.lane.b32.xlu0 %v895_v33, %s1245_s10 }
 0x3e9   : > { %868 = vrot.lane.b32.xlu1 %v860_v32, %s1246_s11 }
 0x3ec   : > { %953 = vrot.lane.b32.xlu0 %v950_v36, %s1247_s12 }
 0x3ed   : > { %951 = vrot.lane.b32.xlu1 %v943_v35, %s1247_s12 }
 0x3f1   : > { %970 = vperm.xlu1 %1195, %v967_v7  }
 0x442   : > { %v926_v38 = vpop.permute.xlu0 %925 }
 0x443   : > { %v760_v39 = vpop.permute.xlu1 %759  ;;  %v928_v57 = vrot.slane %v926_v38, 4 }
 0x444   : > { %v762_v43 = vrot.slane %v760_v39, 4 }
 0x446   : > { %v758_v42 = vpop.permute.xlu0 %757 }
 0x447   : > { %v841_v40 = vpop.permute.xlu1 %840  ;;  %v761_v44 = vrot.slane %v758_v42, 4 }
 0x448   : > { %v844_v51 = vrot.slane %v841_v40, 4 }
 0x449   : > { %v763_v45 = vsel %vm347_vm1, %v761_v44, %v762_v43 }
 0x44a   : > { %v764_v46 = vsel %vm349_vm2, %v758_v42, %v763_v45  ;;  %v816_v47 = vpop.permute.xlu0 %815 }
 0x44b   : > { %v786_v12 = vpop.permute.xlu1 %785  ;;  %766 = vst [vmem:[#allocation3] sm:$0xcc] %v764_v46  ;;  %v818_v1 = vrot.slane %v816_v47, 4 }
 0x44c   : > { %v789_v0 = vrot.slane %v786_v12, 4 }
 0x44e   : > { %v843_v49 = vpop.permute.xlu0 %842 }
 0x44f   : > { %v897_v48 = vpop.permute.xlu1 %896  ;;  %v845_v52 = vrot.slane %v843_v49, 4 }
 0x450   : > { %v900_v11 = vrot.slane %v897_v48, 4 }
 0x451   : > { %v846_v53 = vsel %vm347_vm1, %v844_v51, %v845_v52 }
 0x452   : > { %v847_v54 = vsel %vm457_vm3, %v841_v40, %v846_v53  ;;  %v871_v56 = vpop.permute.xlu0 %870 }
 0x453   : > { %v924_v55 = vpop.permute.xlu1 %923  ;;  %849 = vst [vmem:[#allocation3 + $0x10] sm:$0x33] %v847_v54  ;;  %v873_v13 = vrot.slane %v871_v56, 4 }
 0x454   : > { %v927_v58 = vrot.slane %v924_v55, 4 }
 0x456   : > { %v929_v60 = vsel %vm347_vm1, %v927_v58, %v928_v57  ;;  %v788_v63 = vpop.permute.xlu0 %787 }
 0x457   : > { %v930_v61 = vsel %vm555_vm4, %v924_v55, %v929_v60  ;;  %v814_v62 = vpop.permute.xlu1 %813  ;;  %v790_v3 = vrot.slane %v788_v63, 4 }
 0x458   : > { %932 = vst [vmem:[#allocation3 + $0x18] sm:$0xcc] %v930_v61  ;;  %v817_v2 = vrot.slane %v814_v62, 4 }
 0x459   : > { %v791_v5 = vsel %vm347_vm1, %v789_v0, %v790_v3 }
 0x45a   : > { %v819_v4 = vsel %vm347_vm1, %v817_v2, %v818_v1  ;;  %v792_v8 = vsel %vm394_vm6, %v786_v12, %v791_v5  ;;  %v899_v25 = vpop.permute.xlu0 %898 }
 0x45b   : > { %v820_v6 = vsel %vm429_vm5, %v814_v62, %v819_v4  ;;  %v869_v10 = vpop.permute.xlu1 %868  ;;  %794 = vst [vmem:[#allocation3 + $0x8] sm:$0x33] %v792_v8  ;;  %v901_v15 = vrot.slane %v899_v25, 4 }
 0x45c   : > { %822 = vst [vmem:[#allocation3 + $0x8] sm:$0xcc] %v820_v6  ;;  %v872_v14 = vrot.slane %v869_v10, 4 }
 0x45d   : > { %v902_v17 = vsel %vm347_vm1, %v900_v11, %v901_v15 }
 0x45e   : > { %v874_v16 = vsel %vm347_vm1, %v872_v14, %v873_v13  ;;  %v903_v19 = vsel %vm527_vm8, %v897_v48, %v902_v17  ;;  %v954_v37 = vpop.permute.xlu0 %953 }
 0x45f   : > { %v875_v18 = vsel %vm492_vm7, %v869_v10, %v874_v16  ;;  %v952_v20 = vpop.permute.xlu1 %951  ;;  %905 = vst [vmem:[#allocation3 + $0x18] sm:$0x33] %v903_v19  ;;  %v956_v41 = vrot.slane %v954_v37, 4 }
 0x460   : > { %877 = vst [vmem:[#allocation3 + $0x10] sm:$0xcc] %v875_v18  ;;  %v955_v22 = vrot.slane %v952_v20, 4 }
 0x462   : > { %v957_v21 = vsel %vm347_vm1, %v955_v22, %v956_v41 }
 0x463   : > { %v958_v23 = vsel %vm590_vm9, %v952_v20, %v957_v21  ;;  %v1211_v50 = vld [vmem:[#allocation3 + $0x4] ss:$8 sps:$4 sm:$0xff]   ;;  %v1213_v24 = vld [vmem:[#allocation3] ss:$8 sps:$4 sm:$0xff]  }
 0x464   : > { %960 = vst [vmem:[#allocation3 + $0x20] sm:$0x33] %v958_v23  ;;  %1007 = vmatprep.subr.bf16.mxu1 %v1211_v50 }
 0x465   : > { %1008 = vmatpush1.bf16.msra.mxu1 %v1213_v24 }
 0x467   : > { %v1214_v26 = vld [vmem:[#allocation3 + $0x14] ss:$8 sps:$4 sm:$0xff]   ;;  %v1216_v27 = vld [vmem:[#allocation3 + $0x10] ss:$8 sps:$4 sm:$0xff]  }
 0x468   : > { %1009 = vmatprep.subr.bf16.mxu1 %v1214_v26 }
 0x469   : > { %1010 = vmatpush1.bf16.msra.mxu1 %v1216_v27 }
 0x46b   : > { %v966_v28 = vld [vmem:[#allocation3 + $0x20] sm:$0x33] }
 0x46c   : > { %v1162_v29 = vcombine.high %v966_v28, %v966_v28  ;;  %v1161_v59 = vcombine.low %v966_v28, %v966_v28 }
 0x46e   : > { %1163 = vmatprep.subr.msk.bf16.mxu1 %vm635_vm12, %v1162_v29  ;;  %v1002_v30 = vsel %vm635_vm12, %v1161_v59, 0 }
 0x46f   : > { %1012 = vmatpush1.bf16.msra.mxu1 %v1002_v30 }
 0x470   : > { %v971_v32 = vpop.permute.xlu1 %970 }
 0x472   : > { %1164 = vmatmul.mubr.msk.bf16.vlgmr.msra.gmra.mrb[0].mxu1 %vm631_vm13, %v961_v31 }
 0x545   : > { %v1041_v33 = vpop.f32.mrb[0].mxu1 }
 0x546   : > { %v1042_v34 = vadd.f32 %v1041_v33, %v971_v32  ;;  %v1043_v35 = vpop.f32.mrb[1].mxu1 }
 0x547   : > { %v1044_v36 = vadd.f32 %v1043_v35, %v971_v32  ;;  %v1045_v7 = vpop.f32.mrb[2].mxu1 }
 0x548   : > { %v1046_v38 = vpop.f32.mrb[3].mxu1  ;;  %v1048_v39 = vsel %vm347_vm1, %v1042_v34, 0.0 }
 0x549   : > { %v1049_v40 = vsel %vm347_vm1, %v1044_v36, 0.0 }
 0x54a   : > { %v1050_v42 = vadd.f32 %v1049_v40, %v1048_v39 }
 0x54c   : > { %1051 = vadd.xlane.f32.xlu0 %v1050_v42 }
 0x5d9   : > { %v1052_v43 = vpop.xlane.xlu0 %1051 }
 0x5da   : > { %v1053_v44 = vmul.f32 0.00390625, %v1052_v43 }
 0x5dc   : > { %v1054_v45 = vsub.f32 %v1042_v34, %v1053_v44  ;;  %v1055_v46 = vsub.f32 %v1044_v36, %v1053_v44 }
 0x5de   : > { %v1056_v12 = vmul.f32 %v1054_v45, %v1054_v45  ;;  %v1057_v47 = vmul.f32 %v1055_v46, %v1055_v46 }
 0x5e0   : > { %v1058_v48 = vsel %vm347_vm1, %v1056_v12, 0.0  ;;  %v1059_v49 = vsel %vm347_vm1, %v1057_v47, 0.0 }
 0x5e1   : > { %v1060_v51 = vadd.f32 %v1059_v49, %v1058_v48 }
 0x5e3   : > { %1061 = vadd.xlane.f32.xlu1 %v1060_v51 }
 0x670   : > { %v1062_v52 = vpop.xlane.xlu1 %1061 }
 0x671   : > { %v1063_v53 = vmul.f32 0.00390625, %v1062_v52 }
 0x673   : > { %v1064_v54 = vadd.f32 1e-05, %v1063_v53 }
 0x675   : > { %1221 = vrsqrt.f32 %v1064_v54 }
 0x67f   : > { %v1222_v55 = vpop.eup %1221 }
 0x680   : > { %v1066_v56 = vmul.f32 %v1222_v55, %v1054_v45  ;;  %v1067_v57 = vmul.f32 %v1222_v55, %v1055_v46 }
 0x682   : > { %v1071_v58 = vcombine.low %v1066_v56, %v1067_v57 }
 0x684   : > { %v1073_v60 = vadd.f32 %v1071_v58, %v1294_v9 }
 0x686   : > { %1074 = vst [vmem:[%s224_s26] sm:$0xff] %v1073_v60 }
 0x687 PF: > { %s15_s18 = sadd.s32 1, %s1229_s18  }
 0x688   : > { %p12_p4 = scmp.ge.s32.totalorder %s15_s18, 4  }
 0x68a   :  { %14 = sbr.rel (!%p12_p4) target bundleno = 1 (0x1), region = 70 }

</bundles_post_ra>
